<compile_context>
chip_gen: v5e
topology: v5e:2x2
jax: 0.10.0
libtpu: 0.0.40
codegen_flags: <defaults>
</compile_context>

<pallas_src>
import functools
import math

import jax
import jax.numpy as jnp
from jax import lax
from jax.experimental import pallas as pl
from jax.experimental.pallas import tpu as pltpu


_MAX_TILE_ONEHOT = 256            # tokens / grid step, small-vocab path
_MAX_TILE_GATHER = 128            # tokens / grid step, manual-DMA gather path
_SMALL_VOCAB_MAX_ROWS = 2048
_SMALL_VOCAB_MAX_BYTES = 4 * 1024 * 1024
_VMEM_LIMIT_BYTES = 32 * 1024 * 1024


def _round_up(x, m):
    return ((x + m - 1) // m) * m


# ---------------------------------------------------------------------------
# Path A: vocab table resident in VMEM, one-hot gather on the MXU.
# ---------------------------------------------------------------------------
def _embed_onehot_kernel(ids_ref, table_ref, out_ref, *, scale):
    tile = ids_ref.shape[0]
    vocab = table_ref.shape[0]
    ids = ids_ref[...]                                          # (T, 1) int32
    iota = lax.broadcasted_iota(jnp.int32, (tile, vocab), 1)    # (T, V)
    onehot = (iota == ids).astype(table_ref.dtype)              # (T, V)
    rows = jnp.dot(onehot, table_ref[...],
                   preferred_element_type=jnp.float32)          # (T, D) f32
    out_ref[...] = (rows * scale).astype(out_ref.dtype)


# ---------------------------------------------------------------------------
# Path B: table in HBM, manual double-buffered row-gather DMA.
# ---------------------------------------------------------------------------
def _embed_gather_kernel(ids_smem, emb_hbm, out_ref, buf, sem, *, scale):
    tile = out_ref.shape[0]
    step = pl.program_id(0)
    n_steps = pl.num_programs(0)

    def start_fetch(tile_idx, slot):
        base = tile_idx * tile

        def body(r, carry):
            row = ids_smem[base + r]
            pltpu.make_async_copy(
                emb_hbm.at[pl.ds(row, 1), :],
                buf.at[slot, pl.ds(r, 1), :],
                sem.at[slot],
            ).start()
            return carry

        lax.fori_loop(0, tile, body, 0)

    def wait_fetch(slot):
        def body(r, carry):
            # Source slice is irrelevant for wait(); only sizes/sem must match.
            pltpu.make_async_copy(
                emb_hbm.at[pl.ds(0, 1), :],
                buf.at[slot, pl.ds(r, 1), :],
                sem.at[slot],
            ).wait()
            return carry

        lax.fori_loop(0, tile, body, 0)

    # Prime the pipeline on the first step.
    @pl.when(step == 0)
    def _():
        start_fetch(0, 0)

    # Prefetch next tile's rows into the other slot while this tile finishes.
    @pl.when(step + 1 < n_steps)
    def _():
        start_fetch(step + 1, (step + 1) & 1)

    slot = step & 1
    wait_fetch(slot)
    out_ref[...] = (buf[slot].astype(jnp.float32) * scale).astype(out_ref.dtype)


# ---------------------------------------------------------------------------
# Wrapper
# ---------------------------------------------------------------------------
def input_embeddings(ids, emb_table, d_model=None):
    """Pallas equivalent of `nn.Embedding(V, D)(x) * sqrt(d_model)`."""
    vocab_size, table_d = emb_table.shape
    if d_model is None:
        d_model = table_d
    assert table_d == d_model, "embedding table width must equal d_model"
    scale = float(math.sqrt(d_model))

    orig_shape = ids.shape
    flat_ids = ids.reshape(-1).astype(jnp.int32)
    # Clamp out-of-range / negative (padding) ids so a bad id can never fault
    # the chip with an out-of-bounds row DMA (PyTorch would raise instead).
    flat_ids = jnp.clip(flat_ids, 0, vocab_size - 1)
    n_tokens = flat_ids.shape[0]

    table_bytes = vocab_size * d_model * emb_table.dtype.itemsize
    small_vocab = (vocab_size <= _SMALL_VOCAB_MAX_ROWS
                   and table_bytes <= _SMALL_VOCAB_MAX_BYTES)

    max_tile = _MAX_TILE_ONEHOT if small_vocab else _MAX_TILE_GATHER
    tile = min(max_tile, _round_up(n_tokens, 8))
    n_pad = _round_up(n_tokens, tile)
    if n_pad != n_tokens:
        flat_ids = jnp.pad(flat_ids, (0, n_pad - n_tokens))  # pads with id 0
    n_tiles = n_pad // tile

    if small_vocab:
        out = pl.pallas_call(
            functools.partial(_embed_onehot_kernel, scale=scale),
            out_shape=jax.ShapeDtypeStruct((n_pad, d_model), emb_table.dtype),
            grid_spec=pltpu.PrefetchScalarGridSpec(
                num_scalar_prefetch=0,
                grid=(n_tiles,),
                in_specs=[
                    pl.BlockSpec((tile, 1), lambda i: (i, 0)),
                    # Full table with a constant index_map -> resident in VMEM.
                    pl.BlockSpec((vocab_size, d_model), lambda i: (0, 0)),
                ],
                out_specs=pl.BlockSpec((tile, d_model), lambda i: (i, 0)),
            ),
            compiler_params=pltpu.CompilerParams(
                dimension_semantics=("parallel",),   # independent token tiles
                vmem_limit_bytes=_VMEM_LIMIT_BYTES,
            ),
        )(flat_ids.reshape(n_pad, 1), emb_table)
    else:
        out = pl.pallas_call(
            functools.partial(_embed_gather_kernel, scale=scale),
            out_shape=jax.ShapeDtypeStruct((n_pad, d_model), emb_table.dtype),
            grid_spec=pltpu.PrefetchScalarGridSpec(
                num_scalar_prefetch=1,               # ids -> SMEM
                grid=(n_tiles,),
                in_specs=[pl.BlockSpec(memory_space=pl.ANY)],  # table in HBM
                out_specs=pl.BlockSpec((tile, d_model), lambda i, ids: (i, 0)),
                scratch_shapes=[
                    pltpu.VMEM((2, tile, d_model), emb_table.dtype),
                    pltpu.SemaphoreType.DMA((2,)),
                ],
            ),
            compiler_params=pltpu.CompilerParams(
                # Cross-step double-buffered scratch -> must run in order.
                dimension_semantics=("arbitrary",),
                vmem_limit_bytes=_VMEM_LIMIT_BYTES,
            ),
        )(flat_ids, emb_table)

    return out[:n_tokens].reshape(*orig_shape, d_model)


if __name__ == "__main__":
    # --- main test: small shapes matching the module (batch=2, seq=8) -------
    batch, seq = 2, 8
    d_model, vocab_size = 128, 64

    key = jax.random.PRNGKey(0)
    k_emb, k_ids = jax.random.split(key)

    # nn.Embedding default init is N(0, 1).
    emb_table = jax.random.normal(k_emb, (vocab_size, d_model), dtype=jnp.float32)
    x = jax.random.randint(k_ids, (batch, seq), 0, vocab_size, dtype=jnp.int32)

    out = jax.block_until_ready(input_embeddings(x, emb_table, d_model))
    ref = jnp.take(emb_table, x, axis=0) * math.sqrt(d_model)
    assert out.shape == (batch, seq, d_model), out.shape
    assert out.dtype == jnp.float32, out.dtype
    assert jnp.allclose(out, ref, atol=1e-5, rtol=1e-5), "mismatch (small-vocab path)"

    # --- also exercise the large-vocab manual-DMA gather path (still small) --
    d2, v2 = 128, 4096
    k_emb2, k_ids2 = jax.random.split(jax.random.PRNGKey(1))
    emb2 = jax.random.normal(k_emb2, (v2, d2), dtype=jnp.float32)
    x2 = jax.random.randint(k_ids2, (2, 80), 0, v2, dtype=jnp.int32)

    out2 = jax.block_until_ready(input_embeddings(x2, emb2, d2))
    ref2 = jnp.take(emb2, x2, axis=0) * math.sqrt(d2)
    assert out2.shape == (2, 80, d2), out2.shape
    assert jnp.allclose(out2, ref2, atol=1e-5, rtol=1e-5), "mismatch (gather path)"

    print("KERNEL_OK")
</pallas_src>

<mosaic_0001>
module attributes {stable_mosaic.version = 11 : i64} {
  func.func @_embed_onehot_kernel(%arg0: i32, %arg1: memref<16x1xi32, #tpu.memory_space<vmem>>, %arg2: memref<64x128xf32, #tpu.memory_space<vmem>>, %arg3: memref<16x128xf32, #tpu.memory_space<vmem>>) attributes {dimension_semantics = [#tpu.dimension_semantics<parallel>], iteration_bounds = array<i64: 1>, scalar_prefetch = 0 : i64, scratch_operands = 0 : i64, tpu.core_type = #tpu.core_type<tc>, window_params = [{transform_indices = @transform_0, window_bounds = array<i64: 16, 1>}, {pipeline_mode = #tpu.pipeline_mode<synchronous>, transform_indices = @transform_1, window_bounds = array<i64: 64, 128>}, {transform_indices = @transform_2, window_bounds = array<i64: 16, 128>}]} {
    %c0 = arith.constant 0 : index
    %c0_0 = arith.constant 0 : index
    %0 = vector.load %arg1[%c0, %c0_0] : memref<16x1xi32, #tpu.memory_space<vmem>>, vector<16x1xi32>
    %1 = tpu.iota {dimensions = array<i32: 1>} : vector<16x64xi32>
    %2 = vector.broadcast %0 : vector<16x1xi32> to vector<16x64xi32>
    %3 = arith.cmpi eq, %1, %2 : vector<16x64xi32>
    %4 = arith.extui %3 : vector<16x64xi1> to vector<16x64xi32>
    %5 = arith.sitofp %4 : vector<16x64xi32> to vector<16x64xf32>
    %c0_1 = arith.constant 0 : index
    %c0_2 = arith.constant 0 : index
    %6 = vector.load %arg2[%c0_1, %c0_2] : memref<64x128xf32, #tpu.memory_space<vmem>>, vector<64x128xf32>
    %cst = arith.constant dense<0.000000e+00> : vector<16x128xf32>
    %7 = tpu.matmul %5, %6, %cst {dimension_numbers = #tpu.dot_dimension_numbers<[1], [0], [0], [1], [0, 0, 1, 1], [], []>} : vector<16x64xf32>, vector<64x128xf32>, vector<16x128xf32> -> vector<16x128xf32>
    %cst_3 = arith.constant 11.3137083 : f32
    %8 = vector.broadcast %cst_3 : f32 to vector<16x128xf32>
    %9 = arith.mulf %7, %8 : vector<16x128xf32>
    %c0_4 = arith.constant 0 : index
    %c0_5 = arith.constant 0 : index
    %10 = vector.load %arg3[%c0_4, %c0_5] : memref<16x128xf32, #tpu.memory_space<vmem>>, vector<16x128xf32>
    tpu.vector_store %arg3[%c0_4, %c0_5], %9 {strides = array<i32>} : memref<16x128xf32, #tpu.memory_space<vmem>>, vector<16x128xf32>,
    return
  }
  func.func @transform_0(%arg0: i32) -> (i32, i32) {
    %c0_i32 = arith.constant 0 : i32
    %c0_i32_0 = arith.constant 0 : i32
    return %arg0, %c0_i32 : i32, i32
  }
  func.func @transform_1(%arg0: i32) -> (i32, i32) {
    %c0_i32 = arith.constant 0 : i32
    %c0_i32_0 = arith.constant 0 : i32
    %c0_i32_1 = arith.constant 0 : i32
    return %c0_i32, %c0_i32_0 : i32, i32
  }
  func.func @transform_2(%arg0: i32) -> (i32, i32) {
    %c0_i32 = arith.constant 0 : i32
    %c0_i32_0 = arith.constant 0 : i32
    return %arg0, %c0_i32 : i32, i32
  }
}

</mosaic_0001>

<bundles_post_ra>
// kernel: tpu_custom_call.1
= control target key start
LH: loop header
LB: loop body
LE: loop exit
PB: predicated region body
PF: predicated region fallthrough
CT: control target
= control target key end

     0   :  { %7 = vsyncpa [#allocation3], 0  ;;  %s215_s0 = inlined_call_operand.vmem [shape: s32[16,1], index: 0, kind: input, shape index: {}]   ;;  %s216_s1 = inlined_call_operand.hbm [shape: f32[64,128], index: 1, kind: input, shape index: {}]   ;;  %s217_s2 = inlined_call_operand.hbm [shape: f32[16,128], index: 2, kind: output, shape index: {}]  }
   0x1   :  { %8 = vsyncpa [#allocation4], 0  ;;  %s15_s11 = sshll.u32 %s216_s1, 4  ;;  %s176_s12 = smov [#allocation2]   ;;  %s16_s11 = int_to_ptr.hbm [resolvable:$true] %s15_s11 }
   0x2   :  { %s17_s13 = sshll.u32 %s176_s12, 4  ;;  %s177_s14 = smov 128   ;;  %s18_s13 = int_to_ptr.vmem [resolvable:$true] %s17_s13 }
   0x3   :  { %s178_s15 = smov 8  }
   0x4   :  { %23 = dma.hbm_to_vmem [thread:$0]  %s16_s11, 1024, %s18_s13, [#allocation3], %s177_s14, %s177_s14, %s178_s15  }
   0x5   :  { %172 = dma.done.wait [#allocation3], 1024  }
   0x6   :  { %173 = vsyncadd [#allocation3], 4294966272  ;;  %v179_v0 = vmov 0   ;;  %v28_v1 = vld [vmem:[%s215_s0] sm:$0xff]  ;;  %v51_v2 = vld [vmem:[#allocation2 + $0x38] sm:$0xff]  ;;  %v30_v11 = vlaneseq  ;;  %vm52_vm0 = vcmask 523264  }
   0x7   :  { %123 = vset.pattern.permute.xlu0 %v179_v0  ;;  %67 = vmatpush.msra.mxu0 %v51_v2  ;;  %v50_v3 = vld [vmem:[#allocation2 + $0x30] sm:$0xff]  ;;  %v49_v4 = vld [vmem:[#allocation2 + $0x28] sm:$0xff]  ;;  %v48_v5 = vld [vmem:[#allocation2 + $0x20] sm:$0xff]  ;;  %v180_v14 = vmov 0.0   ;;  %s92_s22 = sshll.u32 %s217_s2, 4  ;;  %s93_s22 = int_to_ptr.hbm [resolvable:$true] %s92_s22 }
   0x8   :  { %33 = vperm.xlu0 %123, %v28_v1   ;;  %109 = vmatpush.msra.mxu1 %v51_v2  ;;  %v29_v6 = vld [vmem:[%s215_s0 + $0x8] sm:$0xff]  ;;  %v47_v7 = vld [vmem:[#allocation2 + $0x18] sm:$0xff]  ;;  %v46_v8 = vld [vmem:[#allocation2 + $0x10] sm:$0xff]  ;;  %v31_v12 = vand.u32 127, %v30_v11  ;;  %s181_s0 = smov [#allocation5]  }
   0x9   :  { %68 = vmatpush.msra.mxu0 %v50_v3  ;;  %v45_v9 = vld [vmem:[#allocation2 + $0x8] sm:$0xff]  ;;  %v44_v10 = vld [vmem:[#allocation2] sm:$0xff]  ;;  %s90_s19 = sshll.u32 %s181_s0, 4  ;;  %s91_s19 = int_to_ptr.vmem [resolvable:$true] %s90_s19 }
   0xa   :  { %110 = vmatpush.msra.mxu1 %v50_v3 }
   0xb   :  { %69 = vmatpush.msra.mxu0 %v49_v4 }
   0xc   :  { %111 = vmatpush.msra.mxu1 %v49_v4 }
   0xd   :  { %70 = vmatpush.msra.mxu0 %v48_v5 }
   0xe   :  { %112 = vmatpush.msra.mxu1 %v48_v5 }
   0xf   :  { %71 = vmatpush.msra.mxu0 %v47_v7 }
  0x10   :  { %36 = vperm.xlu0 %123, %v29_v6   ;;  %113 = vmatpush.msra.mxu1 %v47_v7 }
  0x11   :  { %72 = vmatpush.msra.mxu0 %v46_v8 }
  0x12   :  { %114 = vmatpush.msra.mxu1 %v46_v8 }
  0x13   :  { %73 = vmatpush.msra.mxu0 %v45_v9 }
  0x14   :  { %115 = vmatpush.msra.mxu1 %v45_v9 }
  0x15   :  { %74 = vmatpush.msra.mxu0 %v44_v10 }
  0x16   :  { %116 = vmatpush.msra.mxu1 %v44_v10 }
  0x7a   :  { %v34_v13 = vpop.permute.xlu0 %33 }
  0x7b   :  { %vm38_vm1 = vcmp.eq.s32.totalorder %v31_v12, %v34_v13 }
  0x7c   :  { %v105_v15 = vsel %vm38_vm1, 1.0, %v180_v14 }
  0x7d   :  { %107 = vmatmul.msk.f32.vlgmr.msra.gmra.mxu0 %vm52_vm0, %v105_v15 }
  0x82   :  { %v37_v16 = vpop.permute.xlu0 %36 }
  0x83   :  { %vm39_vm2 = vcmp.eq.s32.totalorder %v31_v12, %v37_v16 }
  0x84   :  { %v106_v17 = vsel %vm39_vm2, 1.0, %v180_v14 }
  0x85   :  { %108 = vmatmul.msk.f32.vlgmr.msra.gmra.mxu1 %vm52_vm0, %v106_v17 }
  0xfa   :  { %v76_v18 = vpop.f32.mrf.mxu0 }
  0xfb   :  { %v82_v19 = vmul.f32 11.313708, %v76_v18 }
  0xfd   :  { %84 = vst [vmem:[#allocation5] sm:$0xff] %v82_v19 }
 0x102   :  { %v79_v20 = vpop.f32.mrf.mxu1 }
 0x103   :  { %v83_v21 = vmul.f32 11.313708, %v79_v20 }
 0x105   :  { %85 = vst [vmem:[#allocation5 + $0x8] sm:$0xff] %v83_v21 }
 0x106   :  { %98 = dma.vmem_to_hbm [thread:$0]  %s91_s19, 256, %s93_s22, [#allocation4], %s177_s14, %s177_s14, %s178_s15  }
 0x107   :  { %174 = dma.done.wait [#allocation4], 256  }
 0x108   :  { %175 = vsyncadd [#allocation4], 4294967040 }
 0x109   :  { %103 = vsyncpa [#allocation3], 1 }
 0x10a   :  { %104 = vsyncpa [#allocation4], 1 }

</bundles_post_ra>
